<compile_context>
chip_gen: v7x
topology: tpu7x:2x2x1
jax: 0.10.0
libtpu: 0.0.40
codegen_flags: <defaults>
</compile_context>

<pallas_src>
import jax
import jax.numpy as jnp
from jax import lax
from jax.experimental import pallas as pl
from jax.experimental.pallas import tpu as pltpu


# ----------------------------------------------------------------------------
# Pallas kernel: whole MLP stack computed on-chip for one batch tile,
# feature-major (transposed) so the batch tile sits in the lane dimension.
# ----------------------------------------------------------------------------
def _make_mlp_kernel(n_linear):
    def kernel(*refs):
        x_ref = refs[0]                       # (TB, D)      batch-major input tile
        out_ref = refs[-1]                    # (d_out, TB)  feature-major output tile
        param_refs = refs[1:-1]               # w0, b0, w1, b1, ...   w:(out,in) b:(out,1)

        # Layer 0: contract x's feature axis directly (A @ B.T on the MXU) so we
        # land in the lane-dense (features, TB) orientation without transposing
        # the large x block.
        h = lax.dot_general(
            param_refs[0][...],
            x_ref[...].astype(jnp.float32),
            dimension_numbers=(((1,), (1,)), ((), ())),
            preferred_element_type=jnp.float32,
        ) + param_refs[1][...]
        if n_linear > 1:
            h = jnp.tanh(h)

        # Remaining layers: h_T = W @ h_T + b, tanh on hidden layers only.
        for i in range(1, n_linear):
            w = param_refs[2 * i][...]        # (out_i, in_i)
            b = param_refs[2 * i + 1][...]    # (out_i, 1) -> broadcasts along lanes
            h = jnp.dot(w, h, preferred_element_type=jnp.float32) + b
            if i < n_linear - 1:
                h = jnp.tanh(h)

        out_ref[...] = h.astype(out_ref.dtype)

    return kernel


# ----------------------------------------------------------------------------
# Batch-tile selection: as large as possible (HBM burst efficiency, few grid
# steps) while keeping >= min_steps steps so the x-DMA / writeback pipeline
# (and v7x megacore sharding) has work to overlap.
# ----------------------------------------------------------------------------
def _pick_batch_tile(B, *, min_tb=512, max_tb=8192, min_steps=6):
    if B <= min_tb:
        return B                              # single step; block == full extent
    tb = (B // min_steps) // 128 * 128        # multiple of 128: lane-dense out blocks
    return max(min_tb, min(tb, max_tb))


# ----------------------------------------------------------------------------
# Wrapper: flatten, tile the batch axis, keep params VMEM-resident.
#   weights[i]: (out_i, in_i)  (nn.Linear layout);  biases[i]: (out_i,)
# ----------------------------------------------------------------------------
def stacked_vector_forward(x, weights, biases, *, x_dtype=None):
    B = x.shape[0]
    xf = x.reshape(B, -1)                     # torch.flatten(x, start_dim=1)
    if x_dtype is not None:
        xf = xf.astype(x_dtype)               # e.g. bf16 storage on v6e/v7x
    D = xf.shape[1]
    n_linear = len(weights)
    d_out = weights[-1].shape[0]
    out_dtype = weights[-1].dtype

    tb = _pick_batch_tile(B)
    grid = (pl.cdiv(B, tb),)

    args = [xf]
    in_specs = [pl.BlockSpec((tb, D), lambda i: (i, 0))]
    for w, b in zip(weights, biases):
        b2 = b.reshape(-1, 1)                 # (out, 1): broadcasts along lane (batch) axis
        args += [w, b2]
        # Constant index_map -> params DMA'd once, stay VMEM-resident across the grid.
        in_specs += [
            pl.BlockSpec(w.shape, lambda i: (0, 0)),
            pl.BlockSpec(b2.shape, lambda i: (0, 0)),
        ]

    # VMEM budget from actual footprint (double-buffered I/O tiles + params +
    # f32 intermediates), capped well below v7x's 64 MiB physical VMEM.
    x_bytes = 2 * tb * D * xf.dtype.itemsize
    out_bytes = 2 * tb * d_out * 4
    param_bytes = 2 * sum(w.size + b.size for w, b in zip(weights, biases)) * 4
    live_bytes = 2 * tb * max(w.shape[0] for w in weights) * 4
    need = x_bytes + out_bytes + param_bytes + live_bytes
    vmem_limit = min(max(int(need * 1.5), 8 << 20), 48 << 20)

    out_t = pl.pallas_call(
        _make_mlp_kernel(n_linear),
        grid=grid,
        in_specs=in_specs,
        out_specs=pl.BlockSpec((d_out, tb), lambda i: (0, i)),
        out_shape=jax.ShapeDtypeStruct((d_out, B), out_dtype),
        compiler_params=pltpu.CompilerParams(
            dimension_semantics=("parallel",),
            vmem_limit_bytes=vmem_limit,
        ),
    )(*args)
    # Transposing the tiny (d_out, B) slab back in the wrapper is negligible.
    return out_t.T


# ----------------------------------------------------------------------------
# Deterministic parameter init (mimics nn.Linear default: U(-1/sqrt(fan_in), .))
# Weights produced in nn.Linear (out, in) layout.
# ----------------------------------------------------------------------------
def init_params(key, n_layers, d_input, hidden_units, d_output):
    dims = [d_input]
    for i in range(n_layers):
        dims.append(hidden_units[i] if i < len(hidden_units) else hidden_units[-1])
    dims.append(d_output)

    weights, biases = [], []
    for i in range(len(dims) - 1):
        key, kw, kb = jax.random.split(key, 3)
        bound = 1.0 / float(dims[i]) ** 0.5
        w = jax.random.uniform(kw, (dims[i + 1], dims[i]), jnp.float32, -bound, bound)
        b = jax.random.uniform(kb, (dims[i + 1],), jnp.float32, -bound, bound)
        weights.append(w)
        biases.append(b)
    return weights, biases


def _reference_forward(x, weights, biases):
    h = x.reshape(x.shape[0], -1).astype(jnp.float32)
    for i, (w, b) in enumerate(zip(weights, biases)):
        h = h @ w.T + b
        if i < len(weights) - 1:
            h = jnp.tanh(h)
    return h


if __name__ == "__main__":
    # Model config: StackedVectorModel(n_layers=2, d_input=64,
    #                                  hidden_units=[32, 32], d_output=8,
    #                                  activation=nn.Tanh, use_batchnorm=False,
    #                                  dropout_rate=0.0)
    n_layers = 2
    hidden_units = [32, 32]
    d_output = 8

    key = jax.random.PRNGKey(0)
    key, kx = jax.random.split(key)
    x = jax.random.normal(kx, (2, 4, 16), dtype=jnp.float32)   # flattens to (2, 64)
    d_input = 4 * 16

    weights, biases = init_params(key, n_layers, d_input, hidden_units, d_output)

    # Small-shape check (single grid step, block == full batch).
    out = jax.block_until_ready(stacked_vector_forward(x, weights, biases))
    ref = _reference_forward(x, weights, biases)
    assert out.shape == (2, d_output)
    assert jnp.allclose(out, ref, atol=2e-3, rtol=2e-3)

    # Tiled / pipelined path: grid > 1, weights VMEM-resident across batch tiles,
    # lane-dense (d_out, TB) output blocks.
    key, kx2 = jax.random.split(key)
    x_big = jax.random.normal(kx2, (2048, 4, 16), dtype=jnp.float32)
    out_big = jax.block_until_ready(stacked_vector_forward(x_big, weights, biases))
    ref_big = _reference_forward(x_big, weights, biases)
    assert out_big.shape == (2048, d_output)
    assert jnp.allclose(out_big, ref_big, atol=2e-3, rtol=2e-3)

    # Ragged batch: exercises partial last tile / masked output writeback.
    x_rag = x_big[:1000]
    out_rag = jax.block_until_ready(stacked_vector_forward(x_rag, weights, biases))
    assert out_rag.shape == (1000, d_output)
    assert jnp.allclose(out_rag, ref_big[:1000], atol=2e-3, rtol=2e-3)

    # bf16 x storage (halves the dominant HBM read on v6e/v7x); f32 accumulation.
    out_bf16 = jax.block_until_ready(
        stacked_vector_forward(x_big, weights, biases, x_dtype=jnp.bfloat16))
    ref_bf16 = _reference_forward(x_big.astype(jnp.bfloat16), weights, biases)
    assert jnp.allclose(out_bf16, ref_bf16, atol=2e-2, rtol=2e-2)

    print("KERNEL_OK")
</pallas_src>

<mosaic_0001>
module attributes {stable_mosaic.version = 11 : i64} {
  func.func @kernel(%arg0: i32, %arg1: memref<2x64xf32, #tpu.memory_space<vmem>>, %arg2: memref<32x64xf32, #tpu.memory_space<vmem>>, %arg3: memref<32x1xf32, #tpu.memory_space<vmem>>, %arg4: memref<32x32xf32, #tpu.memory_space<vmem>>, %arg5: memref<32x1xf32, #tpu.memory_space<vmem>>, %arg6: memref<8x32xf32, #tpu.memory_space<vmem>>, %arg7: memref<8x1xf32, #tpu.memory_space<vmem>>, %arg8: memref<8x2xf32, #tpu.memory_space<vmem>>) attributes {dimension_semantics = [#tpu.dimension_semantics<parallel>], iteration_bounds = array<i64: 1>, scalar_prefetch = 0 : i64, scratch_operands = 0 : i64, tpu.core_type = #tpu.core_type<tc>, window_params = [{transform_indices = @transform_0, window_bounds = array<i64: 2, 64>}, {pipeline_mode = #tpu.pipeline_mode<synchronous>, transform_indices = @transform_1, window_bounds = array<i64: 32, 64>}, {pipeline_mode = #tpu.pipeline_mode<synchronous>, transform_indices = @transform_2, window_bounds = array<i64: 32, 1>}, {pipeline_mode = #tpu.pipeline_mode<synchronous>, transform_indices = @transform_3, window_bounds = array<i64: 32, 32>}, {pipeline_mode = #tpu.pipeline_mode<synchronous>, transform_indices = @transform_4, window_bounds = array<i64: 32, 1>}, {pipeline_mode = #tpu.pipeline_mode<synchronous>, transform_indices = @transform_5, window_bounds = array<i64: 8, 32>}, {pipeline_mode = #tpu.pipeline_mode<synchronous>, transform_indices = @transform_6, window_bounds = array<i64: 8, 1>}, {transform_indices = @transform_7, window_bounds = array<i64: 8, 2>}]} {
    %c0 = arith.constant 0 : index
    %c0_0 = arith.constant 0 : index
    %0 = vector.load %arg2[%c0, %c0_0] : memref<32x64xf32, #tpu.memory_space<vmem>>, vector<32x64xf32>
    %c0_1 = arith.constant 0 : index
    %c0_2 = arith.constant 0 : index
    %1 = vector.load %arg1[%c0_1, %c0_2] : memref<2x64xf32, #tpu.memory_space<vmem>>, vector<2x64xf32>
    %cst = arith.constant dense<0.000000e+00> : vector<32x2xf32>
    %2 = tpu.matmul %0, %1, %cst {dimension_numbers = #tpu.dot_dimension_numbers<[1], [1], [0], [0], [0, 0, 1, 0], [], []>} : vector<32x64xf32>, vector<2x64xf32>, vector<32x2xf32> -> vector<32x2xf32>
    %c0_3 = arith.constant 0 : index
    %c0_4 = arith.constant 0 : index
    %3 = vector.load %arg3[%c0_3, %c0_4] : memref<32x1xf32, #tpu.memory_space<vmem>>, vector<32x1xf32>
    %4 = vector.broadcast %3 : vector<32x1xf32> to vector<32x2xf32>
    %5 = arith.addf %2, %4 : vector<32x2xf32>
    %6 = math.tanh %5 : vector<32x2xf32>
    %c0_5 = arith.constant 0 : index
    %c0_6 = arith.constant 0 : index
    %7 = vector.load %arg4[%c0_5, %c0_6] : memref<32x32xf32, #tpu.memory_space<vmem>>, vector<32x32xf32>
    %c0_7 = arith.constant 0 : index
    %c0_8 = arith.constant 0 : index
    %8 = vector.load %arg5[%c0_7, %c0_8] : memref<32x1xf32, #tpu.memory_space<vmem>>, vector<32x1xf32>
    %cst_9 = arith.constant dense<0.000000e+00> : vector<32x2xf32>
    %9 = tpu.matmul %7, %6, %cst_9 {dimension_numbers = #tpu.dot_dimension_numbers<[1], [0], [0], [1], [0, 0, 1, 1], [], []>} : vector<32x32xf32>, vector<32x2xf32>, vector<32x2xf32> -> vector<32x2xf32>
    %10 = vector.broadcast %8 : vector<32x1xf32> to vector<32x2xf32>
    %11 = arith.addf %9, %10 : vector<32x2xf32>
    %12 = math.tanh %11 : vector<32x2xf32>
    %c0_10 = arith.constant 0 : index
    %c0_11 = arith.constant 0 : index
    %13 = vector.load %arg6[%c0_10, %c0_11] : memref<8x32xf32, #tpu.memory_space<vmem>>, vector<8x32xf32>
    %c0_12 = arith.constant 0 : index
    %c0_13 = arith.constant 0 : index
    %14 = vector.load %arg7[%c0_12, %c0_13] : memref<8x1xf32, #tpu.memory_space<vmem>>, vector<8x1xf32>
    %cst_14 = arith.constant dense<0.000000e+00> : vector<8x2xf32>
    %15 = tpu.matmul %13, %12, %cst_14 {dimension_numbers = #tpu.dot_dimension_numbers<[1], [0], [0], [1], [0, 0, 1, 1], [], []>} : vector<8x32xf32>, vector<32x2xf32>, vector<8x2xf32> -> vector<8x2xf32>
    %16 = vector.broadcast %14 : vector<8x1xf32> to vector<8x2xf32>
    %17 = arith.addf %15, %16 : vector<8x2xf32>
    %c0_15 = arith.constant 0 : index
    %c0_16 = arith.constant 0 : index
    %18 = vector.load %arg8[%c0_15, %c0_16] : memref<8x2xf32, #tpu.memory_space<vmem>>, vector<8x2xf32>
    tpu.vector_store %arg8[%c0_15, %c0_16], %17 {strides = array<i32>} : memref<8x2xf32, #tpu.memory_space<vmem>>, vector<8x2xf32>,
    return
  }
  func.func @transform_0(%arg0: i32) -> (i32, i32) {
    %c0_i32 = arith.constant 0 : i32
    %c0_i32_0 = arith.constant 0 : i32
    return %arg0, %c0_i32 : i32, i32
  }
  func.func @transform_1(%arg0: i32) -> (i32, i32) {
    %c0_i32 = arith.constant 0 : i32
    %c0_i32_0 = arith.constant 0 : i32
    %c0_i32_1 = arith.constant 0 : i32
    return %c0_i32, %c0_i32_0 : i32, i32
  }
  func.func @transform_2(%arg0: i32) -> (i32, i32) {
    %c0_i32 = arith.constant 0 : i32
    %c0_i32_0 = arith.constant 0 : i32
    %c0_i32_1 = arith.constant 0 : i32
    return %c0_i32, %c0_i32_0 : i32, i32
  }
  func.func @transform_3(%arg0: i32) -> (i32, i32) {
    %c0_i32 = arith.constant 0 : i32
    %c0_i32_0 = arith.constant 0 : i32
    %c0_i32_1 = arith.constant 0 : i32
    return %c0_i32, %c0_i32_0 : i32, i32
  }
  func.func @transform_4(%arg0: i32) -> (i32, i32) {
    %c0_i32 = arith.constant 0 : i32
    %c0_i32_0 = arith.constant 0 : i32
    %c0_i32_1 = arith.constant 0 : i32
    return %c0_i32, %c0_i32_0 : i32, i32
  }
  func.func @transform_5(%arg0: i32) -> (i32, i32) {
    %c0_i32 = arith.constant 0 : i32
    %c0_i32_0 = arith.constant 0 : i32
    %c0_i32_1 = arith.constant 0 : i32
    return %c0_i32, %c0_i32_0 : i32, i32
  }
  func.func @transform_6(%arg0: i32) -> (i32, i32) {
    %c0_i32 = arith.constant 0 : i32
    %c0_i32_0 = arith.constant 0 : i32
    %c0_i32_1 = arith.constant 0 : i32
    return %c0_i32, %c0_i32_0 : i32, i32
  }
  func.func @transform_7(%arg0: i32) -> (i32, i32) {
    %c0_i32 = arith.constant 0 : i32
    %c0_i32_0 = arith.constant 0 : i32
    return %c0_i32, %arg0 : i32, i32
  }
}

</mosaic_0001>

<bundles_post_ra>
// kernel: tpu_custom_call.1
= control target key start
LH: loop header
LB: loop body
LE: loop exit
PB: predicated region body
PF: predicated region fallthrough
CT: control target
= control target key end

     0   :  { %vm55_vm0 = vcmask 523264   ;;  %v473_v2 = vmov 0   ;;  %vm188_vm1 = vcmask 261120   ;;  %v474_v37 = vmov 0.0|0.0   ;;  %s588_s0 = inlined_call_operand.vmem [shape: f32[2,64], index: 0, kind: input, shape index: {}]   ;;  %s589_s1 = inlined_call_operand.vmem [shape: f32[32,64], index: 1, kind: input, shape index: {}]   ;;  %s590_s2 = inlined_call_operand.vmem [shape: f32[32,1], index: 2, kind: input, shape index: {}]   ;;  %s591_s4 = inlined_call_operand.vmem [shape: f32[32,1], index: 4, kind: input, shape index: {}]   ;;  %s592_s6 = inlined_call_operand.vmem [shape: f32[8,1], index: 6, kind: input, shape index: {}]   ;;  %s593_s3 = inlined_call_operand.vmem [shape: f32[32,32], index: 3, kind: input, shape index: {}]   ;;  %s594_s5 = inlined_call_operand.vmem [shape: f32[8,32], index: 5, kind: input, shape index: {}]   ;;  %s595_s7 = inlined_call_operand.vmem [shape: f32[8,2], index: 7, kind: output, shape index: {}]  }
   0x1   :  { %v30_v0 = vld [vmem:[%s588_s0] sm:$0x3]  ;;  %455 = vset.pattern.permute.xlu0 %v473_v2  ;;  %456 = vset.pattern.permute.xlu1 %v473_v2  ;;  %v27_v4 = vld [vmem:[%s589_s1 + $0x8] sm:$0xff]  ;;  %v33_v5 = vld [vmem:[%s590_s2 + $0x10] sm:$0xff]  ;;  %vm475_vm2 = vmmov 0   ;;  %v476_v38 = vmov 0.0  }
   0x2   :  { %v26_v1 = vld [vmem:[%s589_s1] sm:$0xff]  ;;  %404 = vmatprep.subr.msk.mxu0 %vm55_vm0, %v30_v0  ;;  %v28_v6 = vld [vmem:[%s589_s1 + $0x10] sm:$0xff]  ;;  %v32_v7 = vld [vmem:[%s590_s2 + $0x8] sm:$0xff]  ;;  %47 = vperm.xlu1 %456, %v33_v5   ;;  %vm370_vm3 = vcmask 15360  }
   0x3   :  { %406 = vmatprep.mubr.msk.f32.mxu0 %vm55_vm0, %v26_v1  ;;  %v31_v3 = vld [vmem:[%s590_s2] sm:$0xff]  ;;  %405 = vmatpush3.xpose.msk.msra.mxu0 %vm55_vm0, %v30_v0  ;;  %v34_v8 = vld [vmem:[%s590_s2 + $0x18] sm:$0xff]  ;;  %v165_v11 = vld [vmem:[%s591_s4 + $0x8] sm:$0xff] }
   0x4   :  { %37 = vperm.xlu0 %455, %v31_v3   ;;  %v29_v9 = vld [vmem:[%s589_s1 + $0x18] sm:$0xff]  ;;  %v164_v10 = vld [vmem:[%s591_s4] sm:$0xff]  ;;  %v166_v12 = vld [vmem:[%s591_s4 + $0x10] sm:$0xff]  ;;  %445 = vmatprep.subr.bf16.mxu0 %v474_v37 }
   0x5   :  { %v167_v13 = vld [vmem:[%s591_s4 + $0x18] sm:$0xff]  ;;  %v291_v14 = vld [vmem:[%s592_s6] sm:$0xff]  ;;  %v161_v34 = vld [vmem:[%s593_s3 + $0x8] sm:$0xff] }
   0x6   :  { %407 = vmatmul.mubr.msk.f32.vlgmr.msra.gmra.mrb[0].mxu0 %vm55_vm0, %v27_v4  ;;  %52 = vperm.xlu1 %456, %v34_v8   ;;  %v160_v15 = vld [vmem:[%s593_s3] sm:$0xff]  ;;  %v162_v35 = vld [vmem:[%s593_s3 + $0x10] sm:$0xff]  ;;  %v163_v36 = vld [vmem:[%s593_s3 + $0x18] sm:$0xff] }
   0x7   :  { %409 = vmatprep.mubr.msk.f32.mxu0 %vm55_vm0, %v28_v6  ;;  %420 = vmatprep.mubr.msk.f32.mxu1 %vm188_vm1, %v160_v15  ;;  %v290_v57 = vld [vmem:[%s594_s5] sm:$0xff] }
   0x8   :  { %42 = vperm.xlu0 %455, %v32_v7  }
   0xa   :  { %410 = vmatmul.mubr.msk.f32.gmra.mrb[2].mxu0 %vm55_vm0, %v29_v9  ;;  %175 = vperm.xlu1 %456, %v165_v11  }
   0xb   :  { %434 = vmatprep.mubr.msk.f32.mxu0 %vm475_vm2, %v476_v38 }
   0xc   :  { %170 = vperm.xlu0 %455, %v164_v10  }
   0xe   :  { %185 = vperm.xlu1 %456, %v167_v13  }
  0x10   :  { %180 = vperm.xlu0 %455, %v166_v12  }
  0x14   :  { %294 = vperm.xlu0 %455, %v291_v14  }
  0x81   :  { %v48_v17 = vpop.permute.xlu1 %47 }
  0x83   :  { %v38_v16 = vpop.permute.xlu0 %37 }
  0x85   :  { %v53_v23 = vpop.permute.xlu1 %52 }
  0x87   :  { %v43_v18 = vpop.permute.xlu0 %42 }
  0x89   :  { %v176_v39 = vpop.permute.xlu1 %175 }
  0x8b   :  { %v171_v40 = vpop.permute.xlu0 %170 }
  0x8d   :  { %v186_v45 = vpop.permute.xlu1 %185 }
  0x8f   :  { %v181_v47 = vpop.permute.xlu0 %180 }
  0x93   :  { %v295_v58 = vpop.permute.xlu0 %294 }
  0xd9   :  { %v408_v19 = vpop.f32.mrb[0].mxu0 }
  0xda   :  { %v143_v20 = vadd.f32 %v408_v19, %v43_v18  ;;  %v137_v21 = vpop.f32.mrb[1].mxu0 }
  0xdb   :  { %v138_v22 = vadd.f32 %v137_v21, %v38_v16 }
  0xdc   :  { %457 = vtanh.f32 %v143_v20 }
  0xdd   :  { %459 = vtanh.f32 %v138_v22  ;;  %v411_v24 = vpop.f32.mrb[2].mxu0 }
  0xde   :  { %v153_v25 = vadd.f32 %v411_v24, %v53_v23  ;;  %v147_v26 = vpop.f32.mrb[3].mxu0 }
  0xdf   :  { %v148_v27 = vadd.f32 %v147_v26, %v48_v17 }
  0xe0   :  { %461 = vtanh.f32 %v153_v25 }
  0xe1   :  { %463 = vtanh.f32 %v148_v27 }
  0xe6   :  { %v458_v28 = vpop.eup %457 }
  0xe7   :  { %v460_v29 = vpop.eup %459 }
  0xe8   :  { %v437_v30 = vpack.c.bf16 %v458_v28, %v460_v29 }
  0xea   :  { %v462_v31 = vpop.eup %461  ;;  %438 = vmatprep.subr.bf16.mxu1 %v437_v30 }
  0xeb   :  { %v464_v32 = vpop.eup %463  ;;  %440 = vmatpush3.bf16.msra.mxu1 %v437_v30 }
  0xec   :  { %v441_v33 = vpack.c.bf16 %v462_v31, %v464_v32 }
  0xee   :  { %442 = vmatprep.subr.bf16.mxu1 %v441_v33 }
  0xef   :  { %444 = vmatpush3.bf16.msra.mxu1 %v441_v33 }
  0xf2   :  { %421 = vmatmul.mubr.msk.f32.vlgmr.msra.gmra.mrb[0].mxu1 %vm188_vm1, %v161_v34 }
  0xf3   :  { %423 = vmatprep.mubr.msk.f32.mxu1 %vm188_vm1, %v162_v35 }
  0xf6   :  { %424 = vmatmul.mubr.msk.f32.gmra.mrb[2].mxu1 %vm188_vm1, %v163_v36 }
 0x1c5   :  { %v422_v41 = vpop.f32.mrb[0].mxu1 }
 0x1c6   :  { %v273_v42 = vadd.f32 %v422_v41, %v176_v39  ;;  %v267_v43 = vpop.f32.mrb[1].mxu1 }
 0x1c7   :  { %v268_v44 = vadd.f32 %v267_v43, %v171_v40 }
 0x1c8   :  { %465 = vtanh.f32 %v273_v42 }
 0x1c9   :  { %467 = vtanh.f32 %v268_v44  ;;  %v425_v46 = vpop.f32.mrb[2].mxu1 }
 0x1ca   :  { %v283_v48 = vadd.f32 %v425_v46, %v186_v45  ;;  %v277_v49 = vpop.f32.mrb[3].mxu1 }
 0x1cb   :  { %v278_v50 = vadd.f32 %v277_v49, %v181_v47 }
 0x1cc   :  { %469 = vtanh.f32 %v283_v48 }
 0x1cd   :  { %471 = vtanh.f32 %v278_v50 }
 0x1d2   :  { %v466_v51 = vpop.eup %465 }
 0x1d3   :  { %v468_v52 = vpop.eup %467 }
 0x1d4   :  { %v446_v53 = vpack.c.bf16 %v466_v51, %v468_v52 }
 0x1d6   :  { %v470_v54 = vpop.eup %469  ;;  %447 = vmatpush3.bf16.msra.mxu0 %v446_v53 }
 0x1d7   :  { %v472_v55 = vpop.eup %471  ;;  %448 = vmatprep.subr.bf16.mxu0 %v474_v37 }
 0x1d8   :  { %v449_v56 = vpack.c.bf16 %v470_v54, %v472_v55 }
 0x1da   :  { %450 = vmatpush3.bf16.msra.mxu0 %v449_v56 }
 0x1dd   :  { %435 = vmatmul.mubr.msk.f32.vlgmr.msra.gmra.mrb[4].mxu0 %vm188_vm1, %v290_v57 }
 0x2b0   :  { %v366_v59 = vpop.f32.mrb[4].mxu0 }
 0x2b1   :  { %v367_v60 = vadd.f32 %v366_v59, %v295_v58  ;;  %v436_v61 = vpop.f32.mrb[5].mxu0 }
 0x2b3   :  { %371 = vst.msk [vmem:[%s595_s7] sm:$0xff] %vm370_vm3, %v367_v60 }

</bundles_post_ra>
